<compile_context>
chip_gen: v6e
topology: v6e:2x2x1
jax: 0.10.0
libtpu: 0.0.40
codegen_flags: <defaults>
</compile_context>

<pallas_src>
import functools

import jax
import jax.numpy as jnp
from jax import lax
from jax.experimental import pallas as pl
from jax.experimental.pallas import tpu as pltpu

LEAKY = 0.1
BN_EPS = 1e-5


# ----------------------------------------------------------------------------
# Kernel 1: tiled matmul + fused per-output-channel scale/shift + LeakyReLU.
# Used for: pointwise 1x1 convs, the first 3x3 conv (im2col), and the FC layer.
# ----------------------------------------------------------------------------
def _matmul_scale_act_kernel(x_ref, w_ref, s_ref, b_ref, o_ref, *, alpha):
    acc = jnp.dot(x_ref[...], w_ref[...], preferred_element_type=jnp.float32)
    y = acc * s_ref[...] + b_ref[...]
    o_ref[...] = jnp.where(y >= 0, y, y * alpha).astype(o_ref.dtype)


def matmul_scale_act(x2d, w, scale, shift, alpha, tm=512):
    """y = LeakyReLU_alpha((x2d @ w) * scale + shift). alpha=1.0 -> identity."""
    M, Cin = x2d.shape
    Cout = w.shape[1]
    # Tile the pixel dim; keep it a multiple of 8 (f32 sublane).
    tm_eff = min(tm, max(8, ((M + 7) // 8) * 8))
    M_pad = ((M + tm_eff - 1) // tm_eff) * tm_eff
    if M_pad != M:
        x2d = jnp.pad(x2d, ((0, M_pad - M), (0, 0)))
    grid = (M_pad // tm_eff,)

    cost = pl.CostEstimate(
        flops=2 * M_pad * Cin * Cout,
        transcendentals=0,
        bytes_accessed=4 * (M_pad * Cin + Cin * Cout + M_pad * Cout + 2 * Cout),
    )

    out = pl.pallas_call(
        functools.partial(_matmul_scale_act_kernel, alpha=alpha),
        out_shape=jax.ShapeDtypeStruct((M_pad, Cout), x2d.dtype),
        grid_spec=pltpu.PrefetchScalarGridSpec(
            num_scalar_prefetch=0,
            grid=grid,
            in_specs=[
                pl.BlockSpec((tm_eff, Cin), lambda i: (i, 0)),   # pixels: tiled
                pl.BlockSpec((Cin, Cout), lambda i: (0, 0)),     # weights: resident
                pl.BlockSpec((1, Cout), lambda i: (0, 0)),       # BN scale
                pl.BlockSpec((1, Cout), lambda i: (0, 0)),       # BN shift / bias
            ],
            out_specs=pl.BlockSpec((tm_eff, Cout), lambda i: (i, 0)),
        ),
        compiler_params=pltpu.CompilerParams(
            dimension_semantics=("parallel",)),
        cost_estimate=cost,
    )(x2d, w, scale.reshape(1, Cout), shift.reshape(1, Cout))
    return out[:M]


# ----------------------------------------------------------------------------
# Kernel 2: depthwise 3x3 conv (stride 1 on padded input) + scale/shift + LeakyReLU.
# ----------------------------------------------------------------------------
def _dw3x3_scale_act_kernel(x_ref, w_ref, s_ref, b_ref, o_ref, *, alpha):
    _, H, W, C = o_ref.shape
    xv = x_ref[...]                                   # (1, H+2, W+2, C)
    acc = jnp.zeros((1, H, W, C), jnp.float32)
    for dy in range(3):
        for dx in range(3):
            tap = xv[:, dy:dy + H, dx:dx + W, :].astype(jnp.float32)
            wk = w_ref[dy * 3 + dx:dy * 3 + dx + 1, :].reshape(1, 1, 1, C)
            acc = acc + tap * wk
    y = acc * s_ref[...].reshape(1, 1, 1, C) + b_ref[...].reshape(1, 1, 1, C)
    o_ref[...] = jnp.where(y >= 0, y, y * alpha).astype(o_ref.dtype)


def dw_conv_bn_act(x, w9c, scale, shift, alpha, stride):
    """x: (N,H,W,C) NHWC; w9c: (9, C) depthwise taps; fused BN + LeakyReLU."""
    N, H, W, C = x.shape
    xpad = jnp.pad(x, ((0, 0), (1, 1), (1, 1), (0, 0)))
    Hp, Wp = H + 2, W + 2

    out = pl.pallas_call(
        functools.partial(_dw3x3_scale_act_kernel, alpha=alpha),
        out_shape=jax.ShapeDtypeStruct((N, H, W, C), x.dtype),
        grid_spec=pltpu.PrefetchScalarGridSpec(
            num_scalar_prefetch=0,
            grid=(N,),
            in_specs=[
                pl.BlockSpec((1, Hp, Wp, C), lambda n: (n, 0, 0, 0)),
                pl.BlockSpec((9, C), lambda n: (0, 0)),
                pl.BlockSpec((1, C), lambda n: (0, 0)),
                pl.BlockSpec((1, C), lambda n: (0, 0)),
            ],
            out_specs=pl.BlockSpec((1, H, W, C), lambda n: (n, 0, 0, 0)),
        ),
        compiler_params=pltpu.CompilerParams(
            dimension_semantics=("parallel",)),
    )(xpad, w9c, scale.reshape(1, C), shift.reshape(1, C))

    if stride == 2:
        # Stride-2 = stride-1 result subsampled; depthwise is cheap vs. pointwise.
        out = out[:, ::2, ::2, :]
    return out


# ----------------------------------------------------------------------------
# Layer wrappers
# ----------------------------------------------------------------------------
def pw_conv_bn_act(x, w, scale, shift, alpha):
    """1x1 conv + BN + LeakyReLU. x: (N,H,W,Cin), w: (Cin,Cout)."""
    N, H, W, Cin = x.shape
    Cout = w.shape[1]
    y = matmul_scale_act(x.reshape(N * H * W, Cin), w, scale, shift, alpha)
    return y.reshape(N, H, W, Cout)


def first_conv_bn_act(x, w_hwio, scale, shift, alpha):
    """3x3 stride-2 pad-1 conv + BN + LeakyReLU via im2col (Cin=3 -> cheap)."""
    N, H, W, Cin = x.shape
    Cout = w_hwio.shape[-1]
    xpad = jnp.pad(x, ((0, 0), (1, 1), (1, 1), (0, 0)))
    Hout = (H + 2 - 3) // 2 + 1
    Wout = (W + 2 - 3) // 2 + 1
    taps = []
    for dy in range(3):
        for dx in range(3):
            taps.append(xpad[:, dy:dy + 2 * Hout - 1:2, dx:dx + 2 * Wout - 1:2, :])
    xcol = jnp.concatenate(taps, axis=-1)                # (N, Hout, Wout, 9*Cin)
    w2 = w_hwio.reshape(9 * Cin, Cout)                   # (dy,dx,cin) flattening matches
    y = matmul_scale_act(xcol.reshape(N * Hout * Wout, 9 * Cin), w2, scale, shift, alpha)
    return y.reshape(N, Hout, Wout, Cout)


# ----------------------------------------------------------------------------
# MobileNetV1 parameters + forward
# ----------------------------------------------------------------------------
DW_CFG = [
    (8, 16, 1), (16, 32, 2), (32, 32, 1), (32, 64, 2), (64, 64, 1),       # stage1
    (64, 128, 2), (128, 128, 1), (128, 128, 1), (128, 128, 1),            # stage2
    (128, 128, 1), (128, 128, 1),
    (128, 256, 2), (256, 256, 1),                                         # stage3
]


def bn_fold(gamma, beta, mean, var):
    scale = gamma / jnp.sqrt(var + BN_EPS)
    shift = beta - mean * scale
    return scale, shift


def make_bn_params(key, c):
    k1, k2, k3, k4 = jax.random.split(key, 4)
    gamma = 1.0 + 0.1 * jax.random.normal(k1, (c,), jnp.float32)
    beta = 0.1 * jax.random.normal(k2, (c,), jnp.float32)
    mean = 0.1 * jax.random.normal(k3, (c,), jnp.float32)
    var = 1.0 + 0.1 * jax.random.uniform(k4, (c,), jnp.float32)
    return gamma, beta, mean, var


def init_params(key):
    params = {}
    key, k1, k2 = jax.random.split(key, 3)
    params["conv0_w"] = jax.random.normal(k1, (3, 3, 3, 8), jnp.float32) / jnp.sqrt(27.0)
    params["conv0_bn"] = make_bn_params(k2, 8)

    layers = []
    for (cin, cout, stride) in DW_CFG:
        key, k1, k2, k3, k4 = jax.random.split(key, 5)
        layers.append(dict(
            dw_w=jax.random.normal(k1, (3, 3, cin), jnp.float32) / 3.0,
            dw_bn=make_bn_params(k2, cin),
            pw_w=jax.random.normal(k3, (cin, cout), jnp.float32) / jnp.sqrt(float(cin)),
            pw_bn=make_bn_params(k4, cout),
            stride=stride,
        ))
    params["layers"] = layers

    key, k1, k2 = jax.random.split(key, 3)
    params["fc_w"] = jax.random.normal(k1, (256, 1000), jnp.float32) / jnp.sqrt(256.0)
    params["fc_b"] = 0.1 * jax.random.normal(k2, (1000,), jnp.float32)
    return params


def mobilenet_v1_forward(params, x_nchw):
    # Single NCHW -> NHWC transpose of the tiny 3-channel input; NHWC thereafter.
    x = jnp.transpose(x_nchw, (0, 2, 3, 1))

    s, sh = bn_fold(*params["conv0_bn"])
    x = first_conv_bn_act(x, params["conv0_w"], s, sh, LEAKY)

    for layer in params["layers"]:
        cin = layer["dw_w"].shape[-1]
        s, sh = bn_fold(*layer["dw_bn"])
        x = dw_conv_bn_act(x, layer["dw_w"].reshape(9, cin), s, sh, LEAKY, layer["stride"])
        s, sh = bn_fold(*layer["pw_bn"])
        x = pw_conv_bn_act(x, layer["pw_w"], s, sh, LEAKY)

    x = jnp.mean(x, axis=(1, 2))                         # adaptive avg pool (1,1)
    ones = jnp.ones((params["fc_w"].shape[1],), jnp.float32)
    return matmul_scale_act(x, params["fc_w"], ones, params["fc_b"], 1.0)


# ----------------------------------------------------------------------------
# Plain-JAX reference (same math via lax.conv) for correctness checking
# ----------------------------------------------------------------------------
def _leaky(x, a):
    return jnp.where(x >= 0, x, a * x)


def mobilenet_v1_reference(params, x_nchw):
    x = jnp.transpose(x_nchw, (0, 2, 3, 1))
    s, sh = bn_fold(*params["conv0_bn"])
    y = lax.conv_general_dilated(x, params["conv0_w"], (2, 2), [(1, 1), (1, 1)],
                                 dimension_numbers=("NHWC", "HWIO", "NHWC"))
    x = _leaky(y * s + sh, LEAKY)
    for layer in params["layers"]:
        cin = layer["dw_w"].shape[-1]
        st = layer["stride"]
        s, sh = bn_fold(*layer["dw_bn"])
        y = lax.conv_general_dilated(x, layer["dw_w"].reshape(3, 3, 1, cin),
                                     (st, st), [(1, 1), (1, 1)],
                                     dimension_numbers=("NHWC", "HWIO", "NHWC"),
                                     feature_group_count=cin)
        x = _leaky(y * s + sh, LEAKY)
        s, sh = bn_fold(*layer["pw_bn"])
        y = jnp.einsum("nhwc,cd->nhwd", x, layer["pw_w"])
        x = _leaky(y * s + sh, LEAKY)
    x = jnp.mean(x, axis=(1, 2))
    return x @ params["fc_w"] + params["fc_b"]


if __name__ == "__main__":
    key = jax.random.PRNGKey(0)
    kp, kx = jax.random.split(key)
    params = init_params(kp)

    N, C, H, W = 2, 3, 64, 64
    x = jax.random.normal(kx, (N, C, H, W), dtype=jnp.float32)

    out = mobilenet_v1_forward(params, x)
    out = jax.block_until_ready(out)
    assert out.shape == (N, 1000)

    ref = jax.block_until_ready(mobilenet_v1_reference(params, x))
    assert jnp.all(jnp.isfinite(out))
    assert jnp.allclose(out, ref, atol=2e-2, rtol=2e-2)

    print("KERNEL_OK")
</pallas_src>

<mosaic_0001>
module attributes {stable_mosaic.version = 11 : i64} {
  func.func @_matmul_scale_act_kernel(%arg0: i32, %arg1: memref<512x27xf32, #tpu.memory_space<vmem>>, %arg2: memref<27x8xf32, #tpu.memory_space<vmem>>, %arg3: memref<1x8xf32, #tpu.memory_space<vmem>>, %arg4: memref<1x8xf32, #tpu.memory_space<vmem>>, %arg5: memref<512x8xf32, #tpu.memory_space<vmem>>) attributes {dimension_semantics = [#tpu.dimension_semantics<parallel>], iteration_bounds = array<i64: 4>, scalar_prefetch = 0 : i64, scratch_operands = 0 : i64, tpu.core_type = #tpu.core_type<tc>, window_params = [{transform_indices = @transform_0, window_bounds = array<i64: 512, 27>}, {pipeline_mode = #tpu.pipeline_mode<synchronous>, transform_indices = @transform_1, window_bounds = array<i64: 27, 8>}, {pipeline_mode = #tpu.pipeline_mode<synchronous>, transform_indices = @transform_2, window_bounds = array<i64: 1, 8>}, {pipeline_mode = #tpu.pipeline_mode<synchronous>, transform_indices = @transform_3, window_bounds = array<i64: 1, 8>}, {transform_indices = @transform_4, window_bounds = array<i64: 512, 8>}]} {
    %c0 = arith.constant 0 : index
    %c0_0 = arith.constant 0 : index
    %0 = vector.load %arg1[%c0, %c0_0] : memref<512x27xf32, #tpu.memory_space<vmem>>, vector<512x27xf32>
    %c0_1 = arith.constant 0 : index
    %c0_2 = arith.constant 0 : index
    %1 = vector.load %arg2[%c0_1, %c0_2] : memref<27x8xf32, #tpu.memory_space<vmem>>, vector<27x8xf32>
    %cst = arith.constant dense<0.000000e+00> : vector<512x8xf32>
    %2 = tpu.matmul %0, %1, %cst {dimension_numbers = #tpu.dot_dimension_numbers<[1], [0], [0], [1], [0, 0, 1, 1], [], []>} : vector<512x27xf32>, vector<27x8xf32>, vector<512x8xf32> -> vector<512x8xf32>
    %c0_3 = arith.constant 0 : index
    %c0_4 = arith.constant 0 : index
    %3 = vector.load %arg3[%c0_3, %c0_4] : memref<1x8xf32, #tpu.memory_space<vmem>>, vector<1x8xf32>
    %4 = vector.broadcast %3 : vector<1x8xf32> to vector<512x8xf32>
    %5 = arith.mulf %2, %4 : vector<512x8xf32>
    %c0_5 = arith.constant 0 : index
    %c0_6 = arith.constant 0 : index
    %6 = vector.load %arg4[%c0_5, %c0_6] : memref<1x8xf32, #tpu.memory_space<vmem>>, vector<1x8xf32>
    %7 = vector.broadcast %6 : vector<1x8xf32> to vector<512x8xf32>
    %8 = arith.addf %5, %7 : vector<512x8xf32>
    %cst_7 = arith.constant 0.000000e+00 : f32
    %9 = vector.broadcast %cst_7 : f32 to vector<512x8xf32>
    %10 = arith.cmpf oge, %8, %9 : vector<512x8xf32>
    %cst_8 = arith.constant 1.000000e-01 : f32
    %11 = vector.broadcast %cst_8 : f32 to vector<512x8xf32>
    %12 = arith.mulf %8, %11 : vector<512x8xf32>
    %13 = arith.select %10, %8, %12 : vector<512x8xi1>, vector<512x8xf32>
    %c0_9 = arith.constant 0 : index
    %c0_10 = arith.constant 0 : index
    %14 = vector.load %arg5[%c0_9, %c0_10] : memref<512x8xf32, #tpu.memory_space<vmem>>, vector<512x8xf32>
    tpu.vector_store %arg5[%c0_9, %c0_10], %13 {strides = array<i32>} : memref<512x8xf32, #tpu.memory_space<vmem>>, vector<512x8xf32>,
    return
  }
  func.func @transform_0(%arg0: i32) -> (i32, i32) {
    %c0_i32 = arith.constant 0 : i32
    %c0_i32_0 = arith.constant 0 : i32
    return %arg0, %c0_i32 : i32, i32
  }
  func.func @transform_1(%arg0: i32) -> (i32, i32) {
    %c0_i32 = arith.constant 0 : i32
    %c0_i32_0 = arith.constant 0 : i32
    %c0_i32_1 = arith.constant 0 : i32
    return %c0_i32, %c0_i32_0 : i32, i32
  }
  func.func @transform_2(%arg0: i32) -> (i32, i32) {
    %c0_i32 = arith.constant 0 : i32
    %c0_i32_0 = arith.constant 0 : i32
    %c0_i32_1 = arith.constant 0 : i32
    return %c0_i32, %c0_i32_0 : i32, i32
  }
  func.func @transform_3(%arg0: i32) -> (i32, i32) {
    %c0_i32 = arith.constant 0 : i32
    %c0_i32_0 = arith.constant 0 : i32
    %c0_i32_1 = arith.constant 0 : i32
    return %c0_i32, %c0_i32_0 : i32, i32
  }
  func.func @transform_4(%arg0: i32) -> (i32, i32) {
    %c0_i32 = arith.constant 0 : i32
    %c0_i32_0 = arith.constant 0 : i32
    return %arg0, %c0_i32 : i32, i32
  }
}

</mosaic_0001>

<bundles_post_ra>
// kernel: tpu_custom_call.1
= control target key start
LH: loop header
LB: loop body
LE: loop exit
PB: predicated region body
PF: predicated region fallthrough
CT: control target
= control target key end

     0   :  { %s1605_s15 = smov 0   ;;  %s2060_s0 = inlined_call_operand.vmem [shape: f32[2048,27], index: 0, kind: input, shape index: {}]   ;;  %s2061_s1 = inlined_call_operand.vmem [shape: f32[27,8], index: 1, kind: input, shape index: {}]   ;;  %s2062_s2 = inlined_call_operand.vmem [shape: f32[1,8], index: 2, kind: input, shape index: {}]   ;;  %s2063_s3 = inlined_call_operand.vmem [shape: f32[1,8], index: 3, kind: input, shape index: {}]   ;;  %s2064_s4 = inlined_call_operand.vmem [shape: f32[2048,8], index: 4, kind: output, shape index: {}]  }
   0x1 LB: > { %s1306_s16 = sadd.s32 4294967295, %s1578_s15   ;;  %p1310_p0 = scmp.ge.s32.totalorder %s1578_s15, 1  ;;  %s1578_s15 = sphi %s1605_s15, %s14_s15  }
   0x2   : > { %p163_p1 = scmp.lt.s32.totalorder %s1578_s15, 5 }
   0x4   : > { %p164_p2 = pnand %p1310_p0, %p163_p1 }
   0x5   : > { %s1311_s21 = sshll.u32 (!%p164_p2), %s1306_s16, 6 }
   0x6   : > { %167 = sbr.rel (%p164_p2) target bundleno = 299 (0x12b), region = 36  ;;  %p190_p3 = scmp.lt.s32.totalorder (!%p164_p2), %s1311_s21, 255 }
   0xb   : > { %v268_v0 = vld [vmem:[%s2061_s1 + $0x18] sm:$0x7]  ;;  %vm462_vm0 = vcmask 1042432   ;;  %v267_v1 = vld [vmem:[%s2061_s1 + $0x10] sm:$0xff]  ;;  %v266_v2 = vld [vmem:[%s2061_s1 + $0x8] sm:$0xff]  ;;  %s2066_s21 = smov (!%p190_p3, %s1311_s21), 255 }
   0xc   : > { %1452 = vmatprep.subr.msk.mxu0 %vm462_vm0, %v268_v0  ;;  %1556 = vmatprep.subr.msk.mxu1 %vm462_vm0, %v268_v0  ;;  %v265_v3 = vld [vmem:[%s2061_s1] sm:$0xff]  ;;  %s1312_s26 = sshll.u32 %s2066_s21, 3  ;;  %vm269_vm1 = vcmask 220160   ;;  %vm1185_vm2 = vcmask 64512  }
   0xd   : > { %1453 = vmatpush3.msk.msra.mxu0 %vm462_vm0, %v268_v0  ;;  %1560 = vmatpush3.msk.msra.mxu1 %vm462_vm0, %v268_v0  ;;  %s1633_s29 = scalar_lea.vmem %s2060_s0, %s1312_s26  ;;  %s1784_s10 = scalar_lea.vmem %s2064_s4, %s1312_s26 }
   0xe   : > { %1454 = vmatprep.subr.mxu0 %v267_v1  ;;  %1557 = vmatprep.subr.mxu1 %v267_v1  ;;  %v201_v4 = vld [vmem:[%s1633_s29] sm:$0xff]  ;;  %v202_v6 = vld [vmem:[%s1633_s29 + $0x8] sm:$0xff]  ;;  %v203_v8 = vld [vmem:[%s1633_s29 + $0x10] sm:$0xff] }
   0xf   : > { %1455 = vmatpush3.msra.mxu0 %v267_v1  ;;  %1561 = vmatpush3.msra.mxu1 %v267_v1  ;;  %v233_v5 = vld [vmem:[%s1633_s29 + $0x100] sm:$0xff]  ;;  %v234_v7 = vld [vmem:[%s1633_s29 + $0x108] sm:$0xff]  ;;  %v235_v9 = vld [vmem:[%s1633_s29 + $0x110] sm:$0xff] }
  0x10   : > { %1456 = vmatprep.subr.mxu0 %v266_v2  ;;  %1558 = vmatprep.subr.mxu1 %v266_v2  ;;  %v204_v10 = vld [vmem:[%s1633_s29 + $0x18] sm:$0xff]  ;;  %v205_v12 = vld [vmem:[%s1633_s29 + $0x20] sm:$0xff]  ;;  %v206_v14 = vld [vmem:[%s1633_s29 + $0x28] sm:$0xff] }
  0x11   : > { %1457 = vmatpush3.msra.mxu0 %v266_v2  ;;  %1562 = vmatpush3.msra.mxu1 %v266_v2  ;;  %v236_v11 = vld [vmem:[%s1633_s29 + $0x118] sm:$0xff]  ;;  %v237_v13 = vld [vmem:[%s1633_s29 + $0x120] sm:$0xff]  ;;  %v238_v15 = vld [vmem:[%s1633_s29 + $0x128] sm:$0xff] }
  0x12   : > { %1458 = vmatprep.subr.mxu0 %v265_v3  ;;  %1559 = vmatprep.subr.mxu1 %v265_v3  ;;  %v207_v16 = vld [vmem:[%s1633_s29 + $0x30] sm:$0xff]  ;;  %v208_v18 = vld [vmem:[%s1633_s29 + $0x38] sm:$0xff]  ;;  %v209_v20 = vld [vmem:[%s1633_s29 + $0x40] sm:$0xff] }
  0x13   : > { %1459 = vmatpush3.msra.mxu0 %v265_v3  ;;  %1563 = vmatpush3.msra.mxu1 %v265_v3  ;;  %v239_v17 = vld [vmem:[%s1633_s29 + $0x130] sm:$0xff]  ;;  %v240_v19 = vld [vmem:[%s1633_s29 + $0x138] sm:$0xff]  ;;  %v241_v21 = vld [vmem:[%s1633_s29 + $0x140] sm:$0xff] }
  0x14   : > { %1460 = vmatprep.mubr.msk.f32.mxu0 %vm269_vm1, %v201_v4  ;;  %1508 = vmatprep.mubr.msk.f32.mxu1 %vm269_vm1, %v233_v5  ;;  %v210_v22 = vld [vmem:[%s1633_s29 + $0x48] sm:$0xff]  ;;  %v211_v24 = vld [vmem:[%s1633_s29 + $0x50] sm:$0xff]  ;;  %v212_v26 = vld [vmem:[%s1633_s29 + $0x58] sm:$0xff] }
  0x15   : > { %1461 = vmatmul.mubr.msk.f32.vlgmr.msra.gmra.mxu0 %vm269_vm1, %v202_v6  ;;  %1509 = vmatmul.mubr.msk.f32.vlgmr.msra.gmra.mxu1 %vm269_vm1, %v234_v7  ;;  %v242_v23 = vld [vmem:[%s1633_s29 + $0x148] sm:$0xff]  ;;  %v243_v25 = vld [vmem:[%s1633_s29 + $0x150] sm:$0xff]  ;;  %v244_v27 = vld [vmem:[%s1633_s29 + $0x158] sm:$0xff] }
  0x16   : > { %1463 = vmatprep.mubr.msk.f32.mxu0 %vm269_vm1, %v203_v8  ;;  %1511 = vmatprep.mubr.msk.f32.mxu1 %vm269_vm1, %v235_v9  ;;  %v213_v28 = vld [vmem:[%s1633_s29 + $0x60] sm:$0xff]  ;;  %v214_v30 = vld [vmem:[%s1633_s29 + $0x68] sm:$0xff]  ;;  %v215_v32 = vld [vmem:[%s1633_s29 + $0x70] sm:$0xff] }
  0x17   : > { %v245_v29 = vld [vmem:[%s1633_s29 + $0x160] sm:$0xff]  ;;  %v246_v31 = vld [vmem:[%s1633_s29 + $0x168] sm:$0xff]  ;;  %v247_v33 = vld [vmem:[%s1633_s29 + $0x170] sm:$0xff] }
  0x18   : > { %v216_v34 = vld [vmem:[%s1633_s29 + $0x78] sm:$0xff]  ;;  %v217_v36 = vld [vmem:[%s1633_s29 + $0x80] sm:$0xff]  ;;  %v218_v38 = vld [vmem:[%s1633_s29 + $0x88] sm:$0xff] }
  0x19   : > { %1464 = vmatmul.mubr.msk.f32.gmra.mxu0 %vm269_vm1, %v204_v10  ;;  %1512 = vmatmul.mubr.msk.f32.gmra.mxu1 %vm269_vm1, %v236_v11  ;;  %v248_v35 = vld [vmem:[%s1633_s29 + $0x178] sm:$0xff]  ;;  %v249_v37 = vld [vmem:[%s1633_s29 + $0x180] sm:$0xff]  ;;  %v250_v39 = vld [vmem:[%s1633_s29 + $0x188] sm:$0xff] }
  0x1a   : > { %1466 = vmatprep.mubr.msk.f32.mxu0 %vm269_vm1, %v205_v12  ;;  %1514 = vmatprep.mubr.msk.f32.mxu1 %vm269_vm1, %v237_v13  ;;  %v219_v40 = vld [vmem:[%s1633_s29 + $0x90] sm:$0xff]  ;;  %v220_v42 = vld [vmem:[%s1633_s29 + $0x98] sm:$0xff]  ;;  %v221_v44 = vld [vmem:[%s1633_s29 + $0xa0] sm:$0xff] }
  0x1b   : > { %v251_v41 = vld [vmem:[%s1633_s29 + $0x190] sm:$0xff]  ;;  %v252_v43 = vld [vmem:[%s1633_s29 + $0x198] sm:$0xff]  ;;  %v253_v45 = vld [vmem:[%s1633_s29 + $0x1a0] sm:$0xff] }
  0x1c   : > { %v222_v46 = vld [vmem:[%s1633_s29 + $0xa8] sm:$0xff]  ;;  %v223_v48 = vld [vmem:[%s1633_s29 + $0xb0] sm:$0xff]  ;;  %v224_v50 = vld [vmem:[%s1633_s29 + $0xb8] sm:$0xff] }
  0x1d   : > { %1467 = vmatmul.mubr.msk.f32.gmra.mxu0 %vm269_vm1, %v206_v14  ;;  %1515 = vmatmul.mubr.msk.f32.gmra.mxu1 %vm269_vm1, %v238_v15  ;;  %v254_v47 = vld [vmem:[%s1633_s29 + $0x1a8] sm:$0xff]  ;;  %v255_v49 = vld [vmem:[%s1633_s29 + $0x1b0] sm:$0xff]  ;;  %v256_v51 = vld [vmem:[%s1633_s29 + $0x1b8] sm:$0xff] }
  0x1e   : > { %1469 = vmatprep.mubr.msk.f32.mxu0 %vm269_vm1, %v207_v16  ;;  %1517 = vmatprep.mubr.msk.f32.mxu1 %vm269_vm1, %v239_v17  ;;  %v225_v52 = vld [vmem:[%s1633_s29 + $0xc0] sm:$0xff]  ;;  %v226_v54 = vld [vmem:[%s1633_s29 + $0xc8] sm:$0xff]  ;;  %v227_v56 = vld [vmem:[%s1633_s29 + $0xd0] sm:$0xff] }
  0x1f   : > { %v257_v53 = vld [vmem:[%s1633_s29 + $0x1c0] sm:$0xff]  ;;  %v258_v55 = vld [vmem:[%s1633_s29 + $0x1c8] sm:$0xff]  ;;  %v259_v57 = vld [vmem:[%s1633_s29 + $0x1d0] sm:$0xff] }
  0x20   : > { %v228_v58 = vld [vmem:[%s1633_s29 + $0xd8] sm:$0xff]  ;;  %v229_v60 = vld [vmem:[%s1633_s29 + $0xe0] sm:$0xff]  ;;  %v230_v62 = vld [vmem:[%s1633_s29 + $0xe8] sm:$0xff] }
  0x21   : > { %1470 = vmatmul.mubr.msk.f32.gmra.mxu0 %vm269_vm1, %v208_v18  ;;  %1518 = vmatmul.mubr.msk.f32.gmra.mxu1 %vm269_vm1, %v240_v19  ;;  %v260_v59 = vld [vmem:[%s1633_s29 + $0x1d8] sm:$0xff]  ;;  %v261_v61 = vld [vmem:[%s1633_s29 + $0x1e0] sm:$0xff]  ;;  %v262_v63 = vld [vmem:[%s1633_s29 + $0x1e8] sm:$0xff] }
  0x22   : > { %1472 = vmatprep.mubr.msk.f32.mxu0 %vm269_vm1, %v209_v20  ;;  %1520 = vmatprep.mubr.msk.f32.mxu1 %vm269_vm1, %v241_v21  ;;  %v231_v0 = vld [vmem:[%s1633_s29 + $0xf0] sm:$0xff]  ;;  %v232_v2 = vld [vmem:[%s1633_s29 + $0xf8] sm:$0xff]  ;;  %v1766_v4 = vld [vmem:[%s2062_s2] ss:$0 sm:$0xff] }
  0x23   : > { %v263_v1 = vld [vmem:[%s1633_s29 + $0x1f0] sm:$0xff]  ;;  %v264_v3 = vld [vmem:[%s1633_s29 + $0x1f8] sm:$0xff]  ;;  %v1771_v6 = vld [vmem:[%s2063_s3] ss:$0 sm:$0xff] }
  0x25   : > { %1473 = vmatmul.mubr.msk.f32.gmra.mxu0 %vm269_vm1, %v210_v22  ;;  %1521 = vmatmul.mubr.msk.f32.gmra.mxu1 %vm269_vm1, %v242_v23 }
  0x26   : > { %1475 = vmatprep.mubr.msk.f32.mxu0 %vm269_vm1, %v211_v24  ;;  %1523 = vmatprep.mubr.msk.f32.mxu1 %vm269_vm1, %v243_v25 }
  0x29   : > { %1476 = vmatmul.mubr.msk.f32.gmra.mxu0 %vm269_vm1, %v212_v26  ;;  %1524 = vmatmul.mubr.msk.f32.gmra.mxu1 %vm269_vm1, %v244_v27 }
  0x2a   : > { %1478 = vmatprep.mubr.msk.f32.mxu0 %vm269_vm1, %v213_v28  ;;  %1526 = vmatprep.mubr.msk.f32.mxu1 %vm269_vm1, %v245_v29 }
  0x2d   : > { %1479 = vmatmul.mubr.msk.f32.gmra.mxu0 %vm269_vm1, %v214_v30  ;;  %1527 = vmatmul.mubr.msk.f32.gmra.mxu1 %vm269_vm1, %v246_v31 }
  0x2e   : > { %1481 = vmatprep.mubr.msk.f32.mxu0 %vm269_vm1, %v215_v32  ;;  %1529 = vmatprep.mubr.msk.f32.mxu1 %vm269_vm1, %v247_v33 }
  0x31   : > { %1482 = vmatmul.mubr.msk.f32.gmra.mxu0 %vm269_vm1, %v216_v34  ;;  %1530 = vmatmul.mubr.msk.f32.gmra.mxu1 %vm269_vm1, %v248_v35 }
  0x32   : > { %1484 = vmatprep.mubr.msk.f32.mxu0 %vm269_vm1, %v217_v36  ;;  %1532 = vmatprep.mubr.msk.f32.mxu1 %vm269_vm1, %v249_v37 }
  0x35   : > { %1485 = vmatmul.mubr.msk.f32.gmra.mxu0 %vm269_vm1, %v218_v38  ;;  %1533 = vmatmul.mubr.msk.f32.gmra.mxu1 %vm269_vm1, %v250_v39 }
  0x36   : > { %1487 = vmatprep.mubr.msk.f32.mxu0 %vm269_vm1, %v219_v40  ;;  %1535 = vmatprep.mubr.msk.f32.mxu1 %vm269_vm1, %v251_v41 }
  0x39   : > { %1488 = vmatmul.mubr.msk.f32.gmra.mxu0 %vm269_vm1, %v220_v42  ;;  %1536 = vmatmul.mubr.msk.f32.gmra.mxu1 %vm269_vm1, %v252_v43 }
  0x3a   : > { %1490 = vmatprep.mubr.msk.f32.mxu0 %vm269_vm1, %v221_v44  ;;  %1538 = vmatprep.mubr.msk.f32.mxu1 %vm269_vm1, %v253_v45 }
  0x3d   : > { %1491 = vmatmul.mubr.msk.f32.gmra.mxu0 %vm269_vm1, %v222_v46  ;;  %1539 = vmatmul.mubr.msk.f32.gmra.mxu1 %vm269_vm1, %v254_v47 }
  0x3e   : > { %1493 = vmatprep.mubr.msk.f32.mxu0 %vm269_vm1, %v223_v48  ;;  %1541 = vmatprep.mubr.msk.f32.mxu1 %vm269_vm1, %v255_v49 }
  0x41   : > { %1494 = vmatmul.mubr.msk.f32.gmra.mxu0 %vm269_vm1, %v224_v50  ;;  %1542 = vmatmul.mubr.msk.f32.gmra.mxu1 %vm269_vm1, %v256_v51 }
  0x42   : > { %1496 = vmatprep.mubr.msk.f32.mxu0 %vm269_vm1, %v225_v52  ;;  %1544 = vmatprep.mubr.msk.f32.mxu1 %vm269_vm1, %v257_v53 }
  0x45   : > { %1497 = vmatmul.mubr.msk.f32.gmra.mxu0 %vm269_vm1, %v226_v54  ;;  %1545 = vmatmul.mubr.msk.f32.gmra.mxu1 %vm269_vm1, %v258_v55 }
  0x46   : > { %1499 = vmatprep.mubr.msk.f32.mxu0 %vm269_vm1, %v227_v56  ;;  %1547 = vmatprep.mubr.msk.f32.mxu1 %vm269_vm1, %v259_v57 }
  0x49   : > { %1500 = vmatmul.mubr.msk.f32.gmra.mxu0 %vm269_vm1, %v228_v58  ;;  %1548 = vmatmul.mubr.msk.f32.gmra.mxu1 %vm269_vm1, %v260_v59 }
  0x4a   : > { %1502 = vmatprep.mubr.msk.f32.mxu0 %vm269_vm1, %v229_v60  ;;  %1550 = vmatprep.mubr.msk.f32.mxu1 %vm269_vm1, %v261_v61 }
  0x4d   : > { %1503 = vmatmul.mubr.msk.f32.gmra.mxu0 %vm269_vm1, %v230_v62  ;;  %1551 = vmatmul.mubr.msk.f32.gmra.mxu1 %vm269_vm1, %v262_v63 }
  0x4e   : > { %1505 = vmatprep.mubr.msk.f32.mxu0 %vm269_vm1, %v231_v0  ;;  %1553 = vmatprep.mubr.msk.f32.mxu1 %vm269_vm1, %v263_v1 }
  0x51   : > { %1506 = vmatmul.mubr.msk.f32.gmra.mxu0 %vm269_vm1, %v232_v2  ;;  %1554 = vmatmul.mubr.msk.f32.gmra.mxu1 %vm269_vm1, %v264_v3 }
  0xd5   : > { %v1462_v5 = vpop.f32.mrf.mxu0  ;;  %v1510_v7 = vpop.f32.mrf.mxu1 }
  0xd6   : > { %v859_v8 = vmul.f32 %v1462_v5, %v1766_v4  ;;  %v891_v9 = vmul.f32 %v1510_v7, %v1766_v4 }
  0xd7   : > { %v532_v10 = vpop.f32.mrf.mxu0  ;;  %v692_v11 = vpop.f32.mrf.mxu1 }
  0xd8   : > { %v930_v12 = vadd.f32 %v1771_v6, %v859_v8  ;;  %v962_v13 = vadd.f32 %v1771_v6, %v891_v9  ;;  %v858_v14 = vmul.f32 %v1766_v4, %v532_v10  ;;  %v890_v15 = vmul.f32 %v1766_v4, %v692_v11 }
  0xd9   : > { %v1465_v16 = vpop.f32.mrf.mxu0  ;;  %v1513_v17 = vpop.f32.mrf.mxu1 }
  0xda   : > { %vm994_vm3 = vcmp.ge.f32.partialorder %v930_v12, 0.0  ;;  %v1058_v18 = vmul.f32 0.1, %v930_v12  ;;  %vm1026_vm4 = vcmp.ge.f32.partialorder %v962_v13, 0.0  ;;  %v1090_v19 = vmul.f32 0.1, %v962_v13 }
  0xdb   : > { %v929_v20 = vadd.f32 %v1771_v6, %v858_v14  ;;  %v961_v21 = vadd.f32 %v1771_v6, %v890_v15  ;;  %v861_v22 = vmul.f32 %v1465_v16, %v1766_v4  ;;  %v893_v23 = vmul.f32 %v1513_v17, %v1766_v4  ;;  %v542_v24 = vpop.f32.mrf.mxu0  ;;  %v702_v25 = vpop.f32.mrf.mxu1 }
  0xdc   : > { %v1122_v26 = vsel %vm994_vm3, %v930_v12, %v1058_v18  ;;  %v1154_v27 = vsel %vm1026_vm4, %v962_v13, %v1090_v19  ;;  %v860_v28 = vmul.f32 %v1766_v4, %v542_v24  ;;  %v892_v29 = vmul.f32 %v1766_v4, %v702_v25 }
  0xdd   : > { %1187 = vst.msk [vmem:[%s1784_s10 + $0x8] sm:$0xff] %vm1185_vm2, %v1122_v26  ;;  %1219 = vst.msk [vmem:[%s1784_s10 + $0x108] sm:$0xff] %vm1185_vm2, %v1154_v27  ;;  %vm993_vm5 = vcmp.ge.f32.partialorder %v929_v20, 0.0  ;;  %v1057_v30 = vmul.f32 0.1, %v929_v20  ;;  %vm1025_vm6 = vcmp.ge.f32.partialorder %v961_v21, 0.0  ;;  %v1468_v32 = vpop.f32.mrf.mxu0  ;;  %v1516_v33 = vpop.f32.mrf.mxu1  ;;  %v932_v34 = vadd.f32 %v1771_v6, %v861_v22 }
  0xde   : > { %v1089_v31 = vmul.f32 0.1, %v961_v21  ;;  %v964_v35 = vadd.f32 %v1771_v6, %v893_v23  ;;  %v931_v36 = vadd.f32 %v1771_v6, %v860_v28  ;;  %v963_v37 = vadd.f32 %v1771_v6, %v892_v29 }
  0xdf   : > { %v1121_v38 = vsel %vm993_vm5, %v929_v20, %v1057_v30  ;;  %v863_v40 = vmul.f32 %v1468_v32, %v1766_v4  ;;  %v895_v41 = vmul.f32 %v1516_v33, %v1766_v4  ;;  %v552_v42 = vpop.f32.mrf.mxu0  ;;  %v712_v43 = vpop.f32.mrf.mxu1  ;;  %vm996_vm7 = vcmp.ge.f32.partialorder %v932_v34, 0.0 }
  0xe0   : > { %v1153_v39 = vsel %vm1025_vm6, %v961_v21, %v1089_v31  ;;  %1186 = vst.msk [vmem:[%s1784_s10] sm:$0xff] %vm1185_vm2, %v1121_v38  ;;  %v1060_v44 = vmul.f32 0.1, %v932_v34  ;;  %vm1028_vm8 = vcmp.ge.f32.partialorder %v964_v35, 0.0  ;;  %v1092_v45 = vmul.f32 0.1, %v964_v35 }
  0xe1   : > { %1218 = vst.msk [vmem:[%s1784_s10 + $0x100] sm:$0xff] %vm1185_vm2, %v1153_v39  ;;  %vm995_vm9 = vcmp.ge.f32.partialorder %v931_v36, 0.0  ;;  %v1059_v46 = vmul.f32 0.1, %v931_v36  ;;  %vm1027_vm10 = vcmp.ge.f32.partialorder %v963_v37, 0.0  ;;  %v1471_v48 = vpop.f32.mrf.mxu0  ;;  %v1519_v49 = vpop.f32.mrf.mxu1  ;;  %v934_v52 = vadd.f32 %v1771_v6, %v863_v40 }
  0xe2   : > { %v1091_v47 = vmul.f32 0.1, %v963_v37  ;;  %v1124_v50 = vsel %vm996_vm7, %v932_v34, %v1060_v44  ;;  %v1156_v51 = vsel %vm1028_vm8, %v964_v35, %v1092_v45  ;;  %v966_v53 = vadd.f32 %v1771_v6, %v895_v41 }
  0xe3   : > { %1189 = vst.msk [vmem:[%s1784_s10 + $0x18] sm:$0xff] %vm1185_vm2, %v1124_v50  ;;  %1221 = vst.msk [vmem:[%s1784_s10 + $0x118] sm:$0xff] %vm1185_vm2, %v1156_v51  ;;  %v1123_v54 = vsel %vm995_vm9, %v931_v36, %v1059_v46  ;;  %v862_v56 = vmul.f32 %v1766_v4, %v552_v42  ;;  %v894_v57 = vmul.f32 %v1766_v4, %v712_v43  ;;  %v562_v58 = vpop.f32.mrf.mxu0  ;;  %v722_v59 = vpop.f32.mrf.mxu1  ;;  %vm998_vm11 = vcmp.ge.f32.partialorder %v934_v52, 0.0 }
  0xe4   : > { %v1155_v55 = vsel %vm1027_vm10, %v963_v37, %v1091_v47  ;;  %1188 = vst.msk [vmem:[%s1784_s10 + $0x10] sm:$0xff] %vm1185_vm2, %v1123_v54  ;;  %v1062_v60 = vmul.f32 0.1, %v934_v52  ;;  %vm1030_vm12 = vcmp.ge.f32.partialorder %v966_v53, 0.0  ;;  %v1094_v61 = vmul.f32 0.1, %v966_v53 }
  0xe5   : > { %1220 = vst.msk [vmem:[%s1784_s10 + $0x110] sm:$0xff] %vm1185_vm2, %v1155_v55  ;;  %v933_v62 = vadd.f32 %v1771_v6, %v862_v56  ;;  %v965_v63 = vadd.f32 %v1771_v6, %v894_v57  ;;  %v865_v0 = vmul.f32 %v1471_v48, %v1766_v4  ;;  %v897_v1 = vmul.f32 %v1519_v49, %v1766_v4  ;;  %v1474_v2 = vpop.f32.mrf.mxu0  ;;  %v1522_v3 = vpop.f32.mrf.mxu1 }
  0xe6   : > { %v1126_v5 = vsel %vm998_vm11, %v934_v52, %v1062_v60  ;;  %v1158_v7 = vsel %vm1030_vm12, %v966_v53, %v1094_v61  ;;  %v864_v8 = vmul.f32 %v1766_v4, %v562_v58  ;;  %v896_v9 = vmul.f32 %v1766_v4, %v722_v59 }
  0xe7   : > { %1191 = vst.msk [vmem:[%s1784_s10 + $0x28] sm:$0xff] %vm1185_vm2, %v1126_v5  ;;  %1223 = vst.msk [vmem:[%s1784_s10 + $0x128] sm:$0xff] %vm1185_vm2, %v1158_v7  ;;  %vm997_vm13 = vcmp.ge.f32.partialorder %v933_v62, 0.0  ;;  %v1061_v10 = vmul.f32 0.1, %v933_v62  ;;  %vm1029_vm14 = vcmp.ge.f32.partialorder %v965_v63, 0.0  ;;  %v572_v12 = vpop.f32.mrf.mxu0  ;;  %v732_v13 = vpop.f32.mrf.mxu1  ;;  %v936_v14 = vadd.f32 %v1771_v6, %v865_v0 }
  0xe8   : > { %v1093_v11 = vmul.f32 0.1, %v965_v63  ;;  %v968_v15 = vadd.f32 %v1771_v6, %v897_v1  ;;  %v935_v16 = vadd.f32 %v1771_v6, %v864_v8  ;;  %v967_v17 = vadd.f32 %v1771_v6, %v896_v9 }
  0xe9   : > { %v1125_v18 = vsel %vm997_vm13, %v933_v62, %v1061_v10  ;;  %v867_v20 = vmul.f32 %v1474_v2, %v1766_v4  ;;  %v899_v21 = vmul.f32 %v1522_v3, %v1766_v4  ;;  %v1477_v22 = vpop.f32.mrf.mxu0  ;;  %v1525_v23 = vpop.f32.mrf.mxu1  ;;  %vm1000_vm15 = vcmp.ge.f32.partialorder %v936_v14, 0.0 }
  0xea   : > { %v1157_v19 = vsel %vm1029_vm14, %v965_v63, %v1093_v11  ;;  %1190 = vst.msk [vmem:[%s1784_s10 + $0x20] sm:$0xff] %vm1185_vm2, %v1125_v18  ;;  %v1064_v24 = vmul.f32 0.1, %v936_v14  ;;  %vm1032_vm0 = vcmp.ge.f32.partialorder %v968_v15, 0.0  ;;  %v1096_v25 = vmul.f32 0.1, %v968_v15 }
  0xeb   : > { %1222 = vst.msk [vmem:[%s1784_s10 + $0x120] sm:$0xff] %vm1185_vm2, %v1157_v19  ;;  %vm999_vm1 = vcmp.ge.f32.partialorder %v935_v16, 0.0  ;;  %v1063_v26 = vmul.f32 0.1, %v935_v16  ;;  %vm1031_vm3 = vcmp.ge.f32.partialorder %v967_v17, 0.0  ;;  %v582_v28 = vpop.f32.mrf.mxu0  ;;  %v742_v29 = vpop.f32.mrf.mxu1  ;;  %v938_v32 = vadd.f32 %v1771_v6, %v867_v20 }
  0xec   : > { %v1095_v27 = vmul.f32 0.1, %v967_v17  ;;  %v1128_v30 = vsel %vm1000_vm15, %v936_v14, %v1064_v24  ;;  %v1160_v31 = vsel %vm1032_vm0, %v968_v15, %v1096_v25  ;;  %v970_v33 = vadd.f32 %v1771_v6, %v899_v21 }
  0xed   : > { %1193 = vst.msk [vmem:[%s1784_s10 + $0x38] sm:$0xff] %vm1185_vm2, %v1128_v30  ;;  %1225 = vst.msk [vmem:[%s1784_s10 + $0x138] sm:$0xff] %vm1185_vm2, %v1160_v31  ;;  %v1127_v34 = vsel %vm999_vm1, %v935_v16, %v1063_v26  ;;  %v866_v36 = vmul.f32 %v1766_v4, %v572_v12  ;;  %v898_v37 = vmul.f32 %v1766_v4, %v732_v13  ;;  %v1480_v38 = vpop.f32.mrf.mxu0  ;;  %v1528_v39 = vpop.f32.mrf.mxu1  ;;  %vm1002_vm4 = vcmp.ge.f32.partialorder %v938_v32, 0.0 }
  0xee   : > { %v1159_v35 = vsel %vm1031_vm3, %v967_v17, %v1095_v27  ;;  %1192 = vst.msk [vmem:[%s1784_s10 + $0x30] sm:$0xff] %vm1185_vm2, %v1127_v34  ;;  %v1066_v40 = vmul.f32 0.1, %v938_v32  ;;  %vm1034_vm5 = vcmp.ge.f32.partialorder %v970_v33, 0.0  ;;  %v1098_v41 = vmul.f32 0.1, %v970_v33 }
  0xef   : > { %1224 = vst.msk [vmem:[%s1784_s10 + $0x130] sm:$0xff] %vm1185_vm2, %v1159_v35  ;;  %v937_v42 = vadd.f32 %v1771_v6, %v866_v36  ;;  %v969_v43 = vadd.f32 %v1771_v6, %v898_v37  ;;  %v869_v44 = vmul.f32 %v1477_v22, %v1766_v4  ;;  %v901_v45 = vmul.f32 %v1525_v23, %v1766_v4  ;;  %v592_v46 = vpop.f32.mrf.mxu0  ;;  %v752_v47 = vpop.f32.mrf.mxu1 }
  0xf0   : > { %v1130_v48 = vsel %vm1002_vm4, %v938_v32, %v1066_v40  ;;  %v1162_v49 = vsel %vm1034_vm5, %v970_v33, %v1098_v41  ;;  %v868_v50 = vmul.f32 %v1766_v4, %v582_v28  ;;  %v900_v51 = vmul.f32 %v1766_v4, %v742_v29 }
  0xf1   : > { %1195 = vst.msk [vmem:[%s1784_s10 + $0x48] sm:$0xff] %vm1185_vm2, %v1130_v48  ;;  %1227 = vst.msk [vmem:[%s1784_s10 + $0x148] sm:$0xff] %vm1185_vm2, %v1162_v49  ;;  %vm1001_vm6 = vcmp.ge.f32.partialorder %v937_v42, 0.0  ;;  %v1065_v52 = vmul.f32 0.1, %v937_v42  ;;  %vm1033_vm7 = vcmp.ge.f32.partialorder %v969_v43, 0.0  ;;  %v1483_v54 = vpop.f32.mrf.mxu0  ;;  %v1531_v55 = vpop.f32.mrf.mxu1  ;;  %v940_v56 = vadd.f32 %v1771_v6, %v869_v44 }
  0xf2   : > { %v1097_v53 = vmul.f32 0.1, %v969_v43  ;;  %v972_v57 = vadd.f32 %v1771_v6, %v901_v45  ;;  %v939_v58 = vadd.f32 %v1771_v6, %v868_v50  ;;  %v971_v59 = vadd.f32 %v1771_v6, %v900_v51 }
  0xf3   : > { %v1129_v60 = vsel %vm1001_vm6, %v937_v42, %v1065_v52  ;;  %v871_v62 = vmul.f32 %v1480_v38, %v1766_v4  ;;  %v903_v63 = vmul.f32 %v1528_v39, %v1766_v4  ;;  %v602_v0 = vpop.f32.mrf.mxu0  ;;  %v762_v1 = vpop.f32.mrf.mxu1  ;;  %vm1004_vm8 = vcmp.ge.f32.partialorder %v940_v56, 0.0 }
  0xf4   : > { %v1161_v61 = vsel %vm1033_vm7, %v969_v43, %v1097_v53  ;;  %1194 = vst.msk [vmem:[%s1784_s10 + $0x40] sm:$0xff] %vm1185_vm2, %v1129_v60  ;;  %v1068_v2 = vmul.f32 0.1, %v940_v56  ;;  %vm1036_vm9 = vcmp.ge.f32.partialorder %v972_v57, 0.0  ;;  %v1100_v3 = vmul.f32 0.1, %v972_v57 }
  0xf5   : > { %1226 = vst.msk [vmem:[%s1784_s10 + $0x140] sm:$0xff] %vm1185_vm2, %v1161_v61  ;;  %vm1003_vm10 = vcmp.ge.f32.partialorder %v939_v58, 0.0  ;;  %v1067_v5 = vmul.f32 0.1, %v939_v58  ;;  %vm1035_vm11 = vcmp.ge.f32.partialorder %v971_v59, 0.0  ;;  %v1486_v8 = vpop.f32.mrf.mxu0  ;;  %v1534_v9 = vpop.f32.mrf.mxu1  ;;  %v942_v12 = vadd.f32 %v1771_v6, %v871_v62 }
  0xf6   : > { %v1099_v7 = vmul.f32 0.1, %v971_v59  ;;  %v1132_v10 = vsel %vm1004_vm8, %v940_v56, %v1068_v2  ;;  %v1164_v11 = vsel %vm1036_vm9, %v972_v57, %v1100_v3  ;;  %v974_v13 = vadd.f32 %v1771_v6, %v903_v63 }
  0xf7   : > { %1197 = vst.msk [vmem:[%s1784_s10 + $0x58] sm:$0xff] %vm1185_vm2, %v1132_v10  ;;  %1229 = vst.msk [vmem:[%s1784_s10 + $0x158] sm:$0xff] %vm1185_vm2, %v1164_v11  ;;  %v1131_v14 = vsel %vm1003_vm10, %v939_v58, %v1067_v5  ;;  %v870_v16 = vmul.f32 %v1766_v4, %v592_v46  ;;  %v902_v17 = vmul.f32 %v1766_v4, %v752_v47  ;;  %v612_v18 = vpop.f32.mrf.mxu0  ;;  %v772_v19 = vpop.f32.mrf.mxu1  ;;  %vm1006_vm12 = vcmp.ge.f32.partialorder %v942_v12, 0.0 }
  0xf8   : > { %v1163_v15 = vsel %vm1035_vm11, %v971_v59, %v1099_v7  ;;  %1196 = vst.msk [vmem:[%s1784_s10 + $0x50] sm:$0xff] %vm1185_vm2, %v1131_v14  ;;  %v1070_v20 = vmul.f32 0.1, %v942_v12  ;;  %vm1038_vm13 = vcmp.ge.f32.partialorder %v974_v13, 0.0  ;;  %v1102_v21 = vmul.f32 0.1, %v974_v13 }
  0xf9   : > { %1228 = vst.msk [vmem:[%s1784_s10 + $0x150] sm:$0xff] %vm1185_vm2, %v1163_v15  ;;  %v941_v22 = vadd.f32 %v1771_v6, %v870_v16  ;;  %v973_v23 = vadd.f32 %v1771_v6, %v902_v17  ;;  %v873_v24 = vmul.f32 %v1483_v54, %v1766_v4  ;;  %v905_v25 = vmul.f32 %v1531_v55, %v1766_v4  ;;  %v1489_v26 = vpop.f32.mrf.mxu0  ;;  %v1537_v27 = vpop.f32.mrf.mxu1 }
  0xfa   : > { %v1134_v28 = vsel %vm1006_vm12, %v942_v12, %v1070_v20  ;;  %v1166_v29 = vsel %vm1038_vm13, %v974_v13, %v1102_v21  ;;  %v872_v30 = vmul.f32 %v1766_v4, %v602_v0  ;;  %v904_v31 = vmul.f32 %v1766_v4, %v762_v1 }
  0xfb   : > { %1199 = vst.msk [vmem:[%s1784_s10 + $0x68] sm:$0xff] %vm1185_vm2, %v1134_v28  ;;  %1231 = vst.msk [vmem:[%s1784_s10 + $0x168] sm:$0xff] %vm1185_vm2, %v1166_v29  ;;  %vm1005_vm14 = vcmp.ge.f32.partialorder %v941_v22, 0.0  ;;  %v1069_v32 = vmul.f32 0.1, %v941_v22  ;;  %vm1037_vm15 = vcmp.ge.f32.partialorder %v973_v23, 0.0  ;;  %v622_v34 = vpop.f32.mrf.mxu0  ;;  %v782_v35 = vpop.f32.mrf.mxu1  ;;  %v944_v36 = vadd.f32 %v1771_v6, %v873_v24 }
  0xfc   : > { %v1101_v33 = vmul.f32 0.1, %v973_v23  ;;  %v976_v37 = vadd.f32 %v1771_v6, %v905_v25  ;;  %v943_v38 = vadd.f32 %v1771_v6, %v872_v30  ;;  %v975_v39 = vadd.f32 %v1771_v6, %v904_v31 }
  0xfd   : > { %v1133_v40 = vsel %vm1005_vm14, %v941_v22, %v1069_v32  ;;  %v875_v42 = vmul.f32 %v1486_v8, %v1766_v4  ;;  %v907_v43 = vmul.f32 %v1534_v9, %v1766_v4  ;;  %v1492_v44 = vpop.f32.mrf.mxu0  ;;  %v1540_v45 = vpop.f32.mrf.mxu1  ;;  %vm1008_vm0 = vcmp.ge.f32.partialorder %v944_v36, 0.0 }
  0xfe   : > { %v1165_v41 = vsel %vm1037_vm15, %v973_v23, %v1101_v33  ;;  %1198 = vst.msk [vmem:[%s1784_s10 + $0x60] sm:$0xff] %vm1185_vm2, %v1133_v40  ;;  %v1072_v46 = vmul.f32 0.1, %v944_v36  ;;  %vm1040_vm1 = vcmp.ge.f32.partialorder %v976_v37, 0.0  ;;  %v1104_v47 = vmul.f32 0.1, %v976_v37 }
  0xff   : > { %1230 = vst.msk [vmem:[%s1784_s10 + $0x160] sm:$0xff] %vm1185_vm2, %v1165_v41  ;;  %vm1007_vm3 = vcmp.ge.f32.partialorder %v943_v38, 0.0  ;;  %v1071_v48 = vmul.f32 0.1, %v943_v38  ;;  %vm1039_vm4 = vcmp.ge.f32.partialorder %v975_v39, 0.0  ;;  %v1902_v50 = vpop.f32.mrf.mxu0  ;;  %v1904_v51 = vpop.f32.mrf.mxu1  ;;  %v946_v54 = vadd.f32 %v1771_v6, %v875_v42 }
 0x100   : > { %v1103_v49 = vmul.f32 0.1, %v975_v39  ;;  %v1136_v52 = vsel %vm1008_vm0, %v944_v36, %v1072_v46  ;;  %v1168_v53 = vsel %vm1040_vm1, %v976_v37, %v1104_v47  ;;  %v978_v55 = vadd.f32 %v1771_v6, %v907_v43 }
 0x101   : > { %1201 = vst.msk [vmem:[%s1784_s10 + $0x78] sm:$0xff] %vm1185_vm2, %v1136_v52  ;;  %1233 = vst.msk [vmem:[%s1784_s10 + $0x178] sm:$0xff] %vm1185_vm2, %v1168_v53  ;;  %v1135_v56 = vsel %vm1007_vm3, %v943_v38, %v1071_v48  ;;  %v874_v58 = vmul.f32 %v1766_v4, %v612_v18  ;;  %v906_v59 = vmul.f32 %v1766_v4, %v772_v19  ;;  %v1914_v60 = vpop.f32.mrf.mxu0  ;;  %v1916_v61 = vpop.f32.mrf.mxu1  ;;  %vm1010_vm5 = vcmp.ge.f32.partialorder %v946_v54, 0.0 }
 0x102   : > { %v1167_v57 = vsel %vm1039_vm4, %v975_v39, %v1103_v49  ;;  %1200 = vst.msk [vmem:[%s1784_s10 + $0x70] sm:$0xff] %vm1185_vm2, %v1135_v56  ;;  %v1074_v62 = vmul.f32 0.1, %v946_v54  ;;  %vm1042_vm6 = vcmp.ge.f32.partialorder %v978_v55, 0.0  ;;  %v1106_v63 = vmul.f32 0.1, %v978_v55 }
 0x103   : > { %1232 = vst.msk [vmem:[%s1784_s10 + $0x170] sm:$0xff] %vm1185_vm2, %v1167_v57  ;;  %v945_v0 = vadd.f32 %v1771_v6, %v874_v58  ;;  %v977_v1 = vadd.f32 %v1771_v6, %v906_v59  ;;  %v877_v2 = vmul.f32 %v1489_v26, %v1766_v4  ;;  %v909_v3 = vmul.f32 %v1537_v27, %v1766_v4  ;;  %v642_v5 = vpop.f32.mrf.mxu0  ;;  %v802_v7 = vpop.f32.mrf.mxu1 }
 0x104   : > { %v1138_v8 = vsel %vm1010_vm5, %v946_v54, %v1074_v62  ;;  %v1170_v9 = vsel %vm1042_vm6, %v978_v55, %v1106_v63  ;;  %v876_v10 = vmul.f32 %v1766_v4, %v622_v34  ;;  %v908_v11 = vmul.f32 %v1766_v4, %v782_v35 }
 0x105   : > { %1203 = vst.msk [vmem:[%s1784_s10 + $0x88] sm:$0xff] %vm1185_vm2, %v1138_v8  ;;  %1235 = vst.msk [vmem:[%s1784_s10 + $0x188] sm:$0xff] %vm1185_vm2, %v1170_v9  ;;  %vm1009_vm7 = vcmp.ge.f32.partialorder %v945_v0, 0.0  ;;  %v1073_v12 = vmul.f32 0.1, %v945_v0  ;;  %vm1041_vm8 = vcmp.ge.f32.partialorder %v977_v1, 0.0  ;;  %v1932_v14 = vpop.f32.mrf.mxu0  ;;  %v1546_v15 = vpop.f32.mrf.mxu1  ;;  %v948_v16 = vadd.f32 %v1771_v6, %v877_v2 }
 0x106   : > { %v1105_v13 = vmul.f32 0.1, %v977_v1  ;;  %v980_v17 = vadd.f32 %v1771_v6, %v909_v3  ;;  %v947_v18 = vadd.f32 %v1771_v6, %v876_v10  ;;  %v979_v19 = vadd.f32 %v1771_v6, %v908_v11 }
 0x107   : > { %v1137_v20 = vsel %vm1009_vm7, %v945_v0, %v1073_v12  ;;  %v879_v22 = vmul.f32 %v1492_v44, %v1766_v4  ;;  %v911_v23 = vmul.f32 %v1540_v45, %v1766_v4  ;;  %v1940_v24 = vpop.f32.mrf.mxu0  ;;  %v1942_v25 = vpop.f32.mrf.mxu1  ;;  %vm1012_vm9 = vcmp.ge.f32.partialorder %v948_v16, 0.0 }
 0x108   : > { %v1169_v21 = vsel %vm1041_vm8, %v977_v1, %v1105_v13  ;;  %1202 = vst.msk [vmem:[%s1784_s10 + $0x80] sm:$0xff] %vm1185_vm2, %v1137_v20  ;;  %v1076_v26 = vmul.f32 0.1, %v948_v16  ;;  %vm1044_vm10 = vcmp.ge.f32.partialorder %v980_v17, 0.0  ;;  %v1108_v27 = vmul.f32 0.1, %v980_v17 }
 0x109   : > { %1234 = vst.msk [vmem:[%s1784_s10 + $0x180] sm:$0xff] %vm1185_vm2, %v1169_v21  ;;  %vm1011_vm11 = vcmp.ge.f32.partialorder %v947_v18, 0.0  ;;  %v1075_v28 = vmul.f32 0.1, %v947_v18  ;;  %vm1043_vm12 = vcmp.ge.f32.partialorder %v979_v19, 0.0  ;;  %v950_v32 = vadd.f32 %v1771_v6, %v879_v22  ;;  %v1501_v38 = vpop.f32.mrf.mxu0  ;;  %v1549_v39 = vpop.f32.mrf.mxu1 }
 0x10a   : > { %v1107_v29 = vmul.f32 0.1, %v979_v19  ;;  %v1140_v30 = vsel %vm1012_vm9, %v948_v16, %v1076_v26  ;;  %v1172_v31 = vsel %vm1044_vm10, %v980_v17, %v1108_v27  ;;  %v982_v33 = vadd.f32 %v1771_v6, %v911_v23 }
 0x10b   : > { %1205 = vst.msk [vmem:[%s1784_s10 + $0x98] sm:$0xff] %vm1185_vm2, %v1140_v30  ;;  %1237 = vst.msk [vmem:[%s1784_s10 + $0x198] sm:$0xff] %vm1185_vm2, %v1172_v31  ;;  %v1139_v34 = vsel %vm1011_vm11, %v947_v18, %v1075_v28  ;;  %v878_v36 = vmul.f32 %v1766_v4, %v1902_v50  ;;  %v910_v37 = vmul.f32 %v1766_v4, %v1904_v51  ;;  %vm1014_vm13 = vcmp.ge.f32.partialorder %v950_v32, 0.0  ;;  %v662_v52 = vpop.f32.mrf.mxu0  ;;  %v822_v53 = vpop.f32.mrf.mxu1 }
 0x10c   : > { %v1171_v35 = vsel %vm1043_vm12, %v979_v19, %v1107_v29  ;;  %1204 = vst.msk [vmem:[%s1784_s10 + $0x90] sm:$0xff] %vm1185_vm2, %v1139_v34  ;;  %v1078_v40 = vmul.f32 0.1, %v950_v32  ;;  %vm1046_vm14 = vcmp.ge.f32.partialorder %v982_v33, 0.0  ;;  %v1110_v41 = vmul.f32 0.1, %v982_v33 }
 0x10d   : > { %1236 = vst.msk [vmem:[%s1784_s10 + $0x190] sm:$0xff] %vm1185_vm2, %v1171_v35  ;;  %v949_v42 = vadd.f32 %v1771_v6, %v878_v36  ;;  %v981_v43 = vadd.f32 %v1771_v6, %v910_v37  ;;  %v881_v44 = vmul.f32 %v1914_v60, %v1766_v4  ;;  %v913_v45 = vmul.f32 %v1916_v61, %v1766_v4  ;;  %v1504_v2 = vpop.f32.mrf.mxu0  ;;  %v1552_v3 = vpop.f32.mrf.mxu1 }
 0x10e   : > { %v1142_v46 = vsel %vm1014_vm13, %v950_v32, %v1078_v40  ;;  %v1174_v47 = vsel %vm1046_vm14, %v982_v33, %v1110_v41  ;;  %v880_v48 = vmul.f32 %v1766_v4, %v642_v5  ;;  %v912_v49 = vmul.f32 %v1766_v4, %v802_v7 }
 0x10f   : > { %1207 = vst.msk [vmem:[%s1784_s10 + $0xa8] sm:$0xff] %vm1185_vm2, %v1142_v46  ;;  %1239 = vst.msk [vmem:[%s1784_s10 + $0x1a8] sm:$0xff] %vm1185_vm2, %v1174_v47  ;;  %vm1013_vm15 = vcmp.ge.f32.partialorder %v949_v42, 0.0  ;;  %v1077_v50 = vmul.f32 0.1, %v949_v42  ;;  %vm1045_vm0 = vcmp.ge.f32.partialorder %v981_v43, 0.0  ;;  %v952_v54 = vadd.f32 %v1771_v6, %v881_v44  ;;  %v672_v20 = vpop.f32.mrf.mxu0  ;;  %v832_v21 = vpop.f32.mrf.mxu1 }
 0x110   : > { %v1109_v51 = vmul.f32 0.1, %v981_v43  ;;  %v984_v55 = vadd.f32 %v1771_v6, %v913_v45  ;;  %v951_v56 = vadd.f32 %v1771_v6, %v880_v48  ;;  %v983_v57 = vadd.f32 %v1771_v6, %v912_v49 }
 0x111   : > { %v1141_v58 = vsel %vm1013_vm15, %v949_v42, %v1077_v50  ;;  %v883_v60 = vmul.f32 %v1932_v14, %v1766_v4  ;;  %v915_v61 = vmul.f32 %v1546_v15, %v1766_v4  ;;  %vm1016_vm1 = vcmp.ge.f32.partialorder %v952_v54, 0.0  ;;  %v1507_v36 = vpop.f32.mrf.mxu0  ;;  %v1555_v37 = vpop.f32.mrf.mxu1 }
 0x112   : > { %v1173_v59 = vsel %vm1045_vm0, %v981_v43, %v1109_v51  ;;  %1206 = vst.msk [vmem:[%s1784_s10 + $0xa0] sm:$0xff] %vm1185_vm2, %v1141_v58  ;;  %v1080_v62 = vmul.f32 0.1, %v952_v54  ;;  %vm1048_vm3 = vcmp.ge.f32.partialorder %v984_v55, 0.0  ;;  %v1112_v63 = vmul.f32 0.1, %v984_v55 }
 0x113   : > { %1238 = vst.msk [vmem:[%s1784_s10 + $0x1a0] sm:$0xff] %vm1185_vm2, %v1173_v59  ;;  %vm1015_vm4 = vcmp.ge.f32.partialorder %v951_v56, 0.0  ;;  %v1079_v0 = vmul.f32 0.1, %v951_v56  ;;  %vm1047_vm5 = vcmp.ge.f32.partialorder %v983_v57, 0.0  ;;  %v954_v8 = vadd.f32 %v1771_v6, %v883_v60  ;;  %v682_v50 = vpop.f32.mrf.mxu0  ;;  %v842_v51 = vpop.f32.mrf.mxu1 }
 0x114   : > { %v1111_v1 = vmul.f32 0.1, %v983_v57  ;;  %v1144_v5 = vsel %vm1016_vm1, %v952_v54, %v1080_v62  ;;  %v1176_v7 = vsel %vm1048_vm3, %v984_v55, %v1112_v63  ;;  %v986_v9 = vadd.f32 %v1771_v6, %v915_v61 }
 0x115   : > { %1209 = vst.msk [vmem:[%s1784_s10 + $0xb8] sm:$0xff] %vm1185_vm2, %v1144_v5  ;;  %1241 = vst.msk [vmem:[%s1784_s10 + $0x1b8] sm:$0xff] %vm1185_vm2, %v1176_v7  ;;  %v1143_v10 = vsel %vm1015_vm4, %v951_v56, %v1079_v0  ;;  %v882_v12 = vmul.f32 %v1766_v4, %v1940_v24  ;;  %v914_v13 = vmul.f32 %v1766_v4, %v1942_v25  ;;  %vm1018_vm6 = vcmp.ge.f32.partialorder %v954_v8, 0.0 }
 0x116   : > { %v1175_v11 = vsel %vm1047_vm5, %v983_v57, %v1111_v1  ;;  %1208 = vst.msk [vmem:[%s1784_s10 + $0xb0] sm:$0xff] %vm1185_vm2, %v1143_v10  ;;  %v1082_v14 = vmul.f32 0.1, %v954_v8  ;;  %vm1050_vm7 = vcmp.ge.f32.partialorder %v986_v9, 0.0  ;;  %v1114_v15 = vmul.f32 0.1, %v986_v9 }
 0x117   : > { %1240 = vst.msk [vmem:[%s1784_s10 + $0x1b0] sm:$0xff] %vm1185_vm2, %v1175_v11  ;;  %v953_v16 = vadd.f32 %v1771_v6, %v882_v12  ;;  %v985_v17 = vadd.f32 %v1771_v6, %v914_v13  ;;  %v885_v18 = vmul.f32 %v1501_v38, %v1766_v4  ;;  %v917_v19 = vmul.f32 %v1549_v39, %v1766_v4 }
 0x118   : > { %v1146_v22 = vsel %vm1018_vm6, %v954_v8, %v1082_v14  ;;  %v1178_v23 = vsel %vm1050_vm7, %v986_v9, %v1114_v15  ;;  %v884_v24 = vmul.f32 %v1766_v4, %v662_v52  ;;  %v916_v25 = vmul.f32 %v1766_v4, %v822_v53 }
 0x119   : > { %1211 = vst.msk [vmem:[%s1784_s10 + $0xc8] sm:$0xff] %vm1185_vm2, %v1146_v22  ;;  %1243 = vst.msk [vmem:[%s1784_s10 + $0x1c8] sm:$0xff] %vm1185_vm2, %v1178_v23  ;;  %vm1017_vm8 = vcmp.ge.f32.partialorder %v953_v16, 0.0  ;;  %v1081_v26 = vmul.f32 0.1, %v953_v16  ;;  %vm1049_vm9 = vcmp.ge.f32.partialorder %v985_v17, 0.0  ;;  %v956_v28 = vadd.f32 %v1771_v6, %v885_v18 }
 0x11a   : > { %v1113_v27 = vmul.f32 0.1, %v985_v17  ;;  %v988_v29 = vadd.f32 %v1771_v6, %v917_v19  ;;  %v955_v30 = vadd.f32 %v1771_v6, %v884_v24  ;;  %v987_v31 = vadd.f32 %v1771_v6, %v916_v25 }
 0x11b   : > { %v1145_v32 = vsel %vm1017_vm8, %v953_v16, %v1081_v26  ;;  %v887_v34 = vmul.f32 %v1504_v2, %v1766_v4  ;;  %v919_v35 = vmul.f32 %v1552_v3, %v1766_v4  ;;  %vm1020_vm10 = vcmp.ge.f32.partialorder %v956_v28, 0.0 }
 0x11c   : > { %v1177_v33 = vsel %vm1049_vm9, %v985_v17, %v1113_v27  ;;  %1210 = vst.msk [vmem:[%s1784_s10 + $0xc0] sm:$0xff] %vm1185_vm2, %v1145_v32  ;;  %v1084_v38 = vmul.f32 0.1, %v956_v28  ;;  %vm1052_vm11 = vcmp.ge.f32.partialorder %v988_v29, 0.0  ;;  %v1116_v39 = vmul.f32 0.1, %v988_v29 }
 0x11d   : > { %1242 = vst.msk [vmem:[%s1784_s10 + $0x1c0] sm:$0xff] %vm1185_vm2, %v1177_v33  ;;  %vm1019_vm12 = vcmp.ge.f32.partialorder %v955_v30, 0.0  ;;  %v1083_v40 = vmul.f32 0.1, %v955_v30  ;;  %vm1051_vm13 = vcmp.ge.f32.partialorder %v987_v31, 0.0  ;;  %v958_v44 = vadd.f32 %v1771_v6, %v887_v34 }
 0x11e   : > { %v1115_v41 = vmul.f32 0.1, %v987_v31  ;;  %v1148_v42 = vsel %vm1020_vm10, %v956_v28, %v1084_v38  ;;  %v1180_v43 = vsel %vm1052_vm11, %v988_v29, %v1116_v39  ;;  %v990_v45 = vadd.f32 %v1771_v6, %v919_v35 }
 0x11f   : > { %1213 = vst.msk [vmem:[%s1784_s10 + $0xd8] sm:$0xff] %vm1185_vm2, %v1148_v42  ;;  %1245 = vst.msk [vmem:[%s1784_s10 + $0x1d8] sm:$0xff] %vm1185_vm2, %v1180_v43  ;;  %v1147_v46 = vsel %vm1019_vm12, %v955_v30, %v1083_v40  ;;  %v886_v48 = vmul.f32 %v1766_v4, %v672_v20  ;;  %v918_v49 = vmul.f32 %v1766_v4, %v832_v21  ;;  %vm1022_vm14 = vcmp.ge.f32.partialorder %v958_v44, 0.0 }
 0x120   : > { %v1179_v47 = vsel %vm1051_vm13, %v987_v31, %v1115_v41  ;;  %1212 = vst.msk [vmem:[%s1784_s10 + $0xd0] sm:$0xff] %vm1185_vm2, %v1147_v46  ;;  %v1086_v52 = vmul.f32 0.1, %v958_v44  ;;  %vm1054_vm15 = vcmp.ge.f32.partialorder %v990_v45, 0.0  ;;  %v1118_v53 = vmul.f32 0.1, %v990_v45 }
 0x121   : > { %1244 = vst.msk [vmem:[%s1784_s10 + $0x1d0] sm:$0xff] %vm1185_vm2, %v1179_v47  ;;  %v957_v54 = vadd.f32 %v1771_v6, %v886_v48  ;;  %v989_v55 = vadd.f32 %v1771_v6, %v918_v49  ;;  %v889_v56 = vmul.f32 %v1507_v36, %v1766_v4  ;;  %v921_v57 = vmul.f32 %v1555_v37, %v1766_v4 }
 0x122   : > { %v1150_v58 = vsel %vm1022_vm14, %v958_v44, %v1086_v52  ;;  %v1182_v59 = vsel %vm1054_vm15, %v990_v45, %v1118_v53  ;;  %v888_v60 = vmul.f32 %v1766_v4, %v682_v50  ;;  %v920_v61 = vmul.f32 %v1766_v4, %v842_v51 }
 0x123   : > { %1215 = vst.msk [vmem:[%s1784_s10 + $0xe8] sm:$0xff] %vm1185_vm2, %v1150_v58  ;;  %1247 = vst.msk [vmem:[%s1784_s10 + $0x1e8] sm:$0xff] %vm1185_vm2, %v1182_v59  ;;  %vm1021_vm0 = vcmp.ge.f32.partialorder %v957_v54, 0.0  ;;  %v1085_v62 = vmul.f32 0.1, %v957_v54  ;;  %vm1053_vm1 = vcmp.ge.f32.partialorder %v989_v55, 0.0  ;;  %v960_v0 = vadd.f32 %v1771_v6, %v889_v56 }
 0x124   : > { %v1117_v63 = vmul.f32 0.1, %v989_v55  ;;  %v992_v1 = vadd.f32 %v1771_v6, %v921_v57  ;;  %v959_v2 = vadd.f32 %v1771_v6, %v888_v60  ;;  %v991_v3 = vadd.f32 %v1771_v6, %v920_v61 }
 0x125   : > { %v1149_v5 = vsel %vm1021_vm0, %v957_v54, %v1085_v62  ;;  %vm1024_vm3 = vcmp.ge.f32.partialorder %v960_v0, 0.0  ;;  %v1088_v7 = vmul.f32 0.1, %v960_v0 }
 0x126   : > { %v1181_v4 = vsel %vm1053_vm1, %v989_v55, %v1117_v63  ;;  %1214 = vst.msk [vmem:[%s1784_s10 + $0xe0] sm:$0xff] %vm1185_vm2, %v1149_v5  ;;  %vm1056_vm4 = vcmp.ge.f32.partialorder %v992_v1, 0.0  ;;  %v1120_v8 = vmul.f32 0.1, %v992_v1  ;;  %vm1023_vm5 = vcmp.ge.f32.partialorder %v959_v2, 0.0 }
 0x127   : > { %1246 = vst.msk [vmem:[%s1784_s10 + $0x1e0] sm:$0xff] %vm1185_vm2, %v1181_v4  ;;  %v1087_v9 = vmul.f32 0.1, %v959_v2  ;;  %vm1055_vm6 = vcmp.ge.f32.partialorder %v991_v3, 0.0  ;;  %v1119_v10 = vmul.f32 0.1, %v991_v3  ;;  %v1152_v11 = vsel %vm1024_vm3, %v960_v0, %v1088_v7 }
 0x128   : > { %v1184_v12 = vsel %vm1056_vm4, %v992_v1, %v1120_v8  ;;  %1217 = vst.msk [vmem:[%s1784_s10 + $0xf8] sm:$0xff] %vm1185_vm2, %v1152_v11 }
 0x129   : > { %1249 = vst.msk [vmem:[%s1784_s10 + $0x1f8] sm:$0xff] %vm1185_vm2, %v1184_v12  ;;  %v1151_v6 = vsel %vm1023_vm5, %v959_v2, %v1087_v9  ;;  %v1183_v13 = vsel %vm1055_vm6, %v991_v3, %v1119_v10 }
 0x12a   : > { %1216 = vst.msk [vmem:[%s1784_s10 + $0xf0] sm:$0xff] %vm1185_vm2, %v1151_v6  ;;  %1248 = vst.msk [vmem:[%s1784_s10 + $0x1f0] sm:$0xff] %vm1185_vm2, %v1183_v13 }
 0x12b PF: > { %s14_s15 = sadd.s32 1, %s1578_s15  }
 0x12c   : > { %p11_p4 = scmp.ge.s32.totalorder %s14_s15, 6  }
 0x12e   :  { %13 = sbr.rel (!%p11_p4) target bundleno = 1 (0x1), region = 66 }

</bundles_post_ra>
